<compile_context>
chip_gen: v6e
topology: v6e:2x2x1
jax: 0.10.0
libtpu: 0.0.40
codegen_flags: <defaults>
</compile_context>

<pallas_src>
import jax
import jax.numpy as jnp
from jax.experimental import pallas as pl
from jax.experimental.pallas import tpu as pltpu

H_PAD = 128       # hidden dim 100 padded to a lane multiple
C_PAD = 8         # class dim 3 padded to a sublane multiple
NEG_BIG = -1e30   # effectively -inf for padded class logits (exp underflows to 0)


def mlp_softmax_kernel(x_ref, w1_ref, b1_ref, w23_ref, b23_ref, out_ref):
    # x_ref:   (in_dim, tb)    batch on the lane axis
    # w1_ref:  (H_PAD, in_dim) fc1 weight, transposed + hidden-padded
    # b1_ref:  (H_PAD, 1)
    # w23_ref: (C_PAD, H_PAD)  folded fc2@fc3 weight, transposed + padded
    # b23_ref: (C_PAD, 1)      padded class rows carry -1e30 bias
    # out_ref: (C_PAD, tb)

    # fc1 + ReLU  (padded hidden rows have zero weight/bias -> ReLU(0) = 0)
    h1 = jnp.dot(w1_ref[...], x_ref[...], preferred_element_type=jnp.float32)
    h1 = jnp.maximum(h1 + b1_ref[...], 0.0)                       # (H_PAD, tb)

    # fused fc2@fc3:  logits^T = (w2@w3)^T h1 + (b2@w3 + b3)^T
    logits = jnp.dot(w23_ref[...], h1, preferred_element_type=jnp.float32)
    logits = logits + b23_ref[...]                                # (C_PAD, tb)

    # softmax over the class (sublane) axis; padded classes -> exp(~-1e30) = 0
    m = jnp.max(logits, axis=0, keepdims=True)
    e = jnp.exp(logits - m)
    denom = jnp.sum(e, axis=0, keepdims=True)
    out_ref[...] = (e / denom).astype(out_ref.dtype)   # exact: columns sum to 1


def prepare_params(params):
    """Fold fc2/fc3, transpose to class-major, and pad (done once)."""
    w1, b1, w2, b2, w3, b3 = params
    in_dim, hidden = w1.shape
    n_classes = w3.shape[1]

    # Algebraic fold: no activation between fc2 and fc3.
    w23 = w2 @ w3              # (100, 3)
    b23 = b2 @ w3 + b3         # (1, 3)

    w1T = jnp.zeros((H_PAD, in_dim), jnp.float32).at[:hidden, :].set(w1.T)
    b1T = jnp.zeros((H_PAD, 1), jnp.float32).at[:hidden, 0].set(b1[0])
    w23T = jnp.zeros((C_PAD, H_PAD), jnp.float32).at[:n_classes, :hidden].set(w23.T)
    b23T = jnp.full((C_PAD, 1), NEG_BIG, jnp.float32).at[:n_classes, 0].set(b23[0])
    return (w1T, b1T, w23T, b23T), n_classes


def mlp_forward(x, prepared, n_classes, *, tb_max=1024):
    """x: (B, in_dim) f32 -> (B, n_classes) softmax probabilities."""
    w1T, b1T, w23T, b23T = prepared
    B, in_dim = x.shape

    # Batch is the lane axis of every block -> tile must be a multiple of 128.
    n_lane_groups = pl.cdiv(B, 128)
    if n_lane_groups >= 2:
        # Keep >= 2 grid steps so both v7x TensorCores get work; cap at tb_max.
        tb_groups = max(1, min(tb_max // 128, pl.cdiv(n_lane_groups, 2)))
    else:
        tb_groups = 1
    tb = tb_groups * 128

    B_pad = pl.cdiv(B, tb) * tb
    x_t = x.T                                           # (in_dim, B) lane-dense
    if B_pad != B:
        x_t = jnp.pad(x_t, ((0, 0), (0, B_pad - B)))    # zero cols -> finite softmax

    grid = (B_pad // tb,)

    out_t = pl.pallas_call(
        mlp_softmax_kernel,
        out_shape=jax.ShapeDtypeStruct((C_PAD, B_pad), jnp.float32),
        grid=grid,
        in_specs=[
            pl.BlockSpec((in_dim, tb), lambda i: (0, i)),   # x^T: batch-tiled (lanes)
            pl.BlockSpec(w1T.shape, lambda i: (0, 0)),      # weights resident in VMEM
            pl.BlockSpec(b1T.shape, lambda i: (0, 0)),
            pl.BlockSpec(w23T.shape, lambda i: (0, 0)),
            pl.BlockSpec(b23T.shape, lambda i: (0, 0)),
        ],
        out_specs=pl.BlockSpec((C_PAD, tb), lambda i: (0, i)),  # lane-dense output
        compiler_params=pltpu.CompilerParams(
            dimension_semantics=("parallel",)),                 # megacore on v7x
    )(x_t, w1T, b1T, w23T, b23T)

    # Only (n_classes, B) is sliced/transposed here (~12 B/row, not 512 B/row).
    return out_t[:n_classes, :B].T


def init_params(key):
    """Deterministic init mimicking PyTorch Linear default (U[-1/sqrt(fan_in), +])."""
    def linear(key, fan_in, fan_out):
        kw, kb = jax.random.split(key)
        bound = 1.0 / (fan_in ** 0.5)
        w = jax.random.uniform(kw, (fan_in, fan_out), jnp.float32, -bound, bound)
        b = jax.random.uniform(kb, (1, fan_out), jnp.float32, -bound, bound)
        return w, b

    k1, k2, k3 = jax.random.split(key, 3)
    w1, b1 = linear(k1, 4, 100)
    w2, b2 = linear(k2, 100, 100)
    w3, b3 = linear(k3, 100, 3)
    return (w1, b1, w2, b2, w3, b3)


if __name__ == "__main__":
    key = jax.random.PRNGKey(0)
    k_params, k_x = jax.random.split(key)

    params = init_params(k_params)
    x = jax.random.normal(k_x, (8, 4), dtype=jnp.float32)

    prepared, n_classes = prepare_params(params)   # fold + transpose + pad once
    out = mlp_forward(x, prepared, n_classes)
    out = jax.block_until_ready(out)

    # Pure-JAX reference of the ORIGINAL 3-layer module (no folding).
    w1, b1, w2, b2, w3, b3 = params
    h = jnp.maximum(x @ w1 + b1, 0.0)
    h = h @ w2 + b2
    logits = h @ w3 + b3
    ref = jax.nn.softmax(logits, axis=1)

    assert out.shape == (8, 3)
    # fc2/fc3 fold changes accumulation order slightly -> small tolerance.
    assert jnp.allclose(out, ref, atol=2e-3, rtol=2e-3)
    # Exact division in the kernel -> rows sum to 1 within f32 rounding.
    assert jnp.allclose(out.sum(axis=1), 1.0, atol=1e-3)

    print("KERNEL_OK")
</pallas_src>

<mosaic_0001>
module attributes {stable_mosaic.version = 11 : i64} {
  func.func @mlp_softmax_kernel(%arg0: i32, %arg1: memref<4x128xf32, #tpu.memory_space<vmem>>, %arg2: memref<128x4xf32, #tpu.memory_space<vmem>>, %arg3: memref<128x1xf32, #tpu.memory_space<vmem>>, %arg4: memref<8x128xf32, #tpu.memory_space<vmem>>, %arg5: memref<8x1xf32, #tpu.memory_space<vmem>>, %arg6: memref<8x128xf32, #tpu.memory_space<vmem>>) attributes {dimension_semantics = [#tpu.dimension_semantics<parallel>], iteration_bounds = array<i64: 1>, scalar_prefetch = 0 : i64, scratch_operands = 0 : i64, tpu.core_type = #tpu.core_type<tc>, window_params = [{transform_indices = @transform_0, window_bounds = array<i64: 4, 128>}, {pipeline_mode = #tpu.pipeline_mode<synchronous>, transform_indices = @transform_1, window_bounds = array<i64: 128, 4>}, {pipeline_mode = #tpu.pipeline_mode<synchronous>, transform_indices = @transform_2, window_bounds = array<i64: 128, 1>}, {pipeline_mode = #tpu.pipeline_mode<synchronous>, transform_indices = @transform_3, window_bounds = array<i64: 8, 128>}, {pipeline_mode = #tpu.pipeline_mode<synchronous>, transform_indices = @transform_4, window_bounds = array<i64: 8, 1>}, {transform_indices = @transform_5, window_bounds = array<i64: 8, 128>}]} {
    %c0 = arith.constant 0 : index
    %c0_0 = arith.constant 0 : index
    %0 = vector.load %arg2[%c0, %c0_0] : memref<128x4xf32, #tpu.memory_space<vmem>>, vector<128x4xf32>
    %c0_1 = arith.constant 0 : index
    %c0_2 = arith.constant 0 : index
    %1 = vector.load %arg1[%c0_1, %c0_2] : memref<4x128xf32, #tpu.memory_space<vmem>>, vector<4x128xf32>
    %cst = arith.constant dense<0.000000e+00> : vector<128x128xf32>
    %2 = tpu.matmul %0, %1, %cst {dimension_numbers = #tpu.dot_dimension_numbers<[1], [0], [0], [1], [0, 0, 1, 1], [], []>} : vector<128x4xf32>, vector<4x128xf32>, vector<128x128xf32> -> vector<128x128xf32>
    %c0_3 = arith.constant 0 : index
    %c0_4 = arith.constant 0 : index
    %3 = vector.load %arg3[%c0_3, %c0_4] : memref<128x1xf32, #tpu.memory_space<vmem>>, vector<128x1xf32>
    %4 = vector.broadcast %3 : vector<128x1xf32> to vector<128x128xf32>
    %5 = arith.addf %2, %4 : vector<128x128xf32>
    %cst_5 = arith.constant 0.000000e+00 : f32
    %6 = vector.broadcast %cst_5 : f32 to vector<128x128xf32>
    %7 = arith.maximumf %5, %6 : vector<128x128xf32>
    %c0_6 = arith.constant 0 : index
    %c0_7 = arith.constant 0 : index
    %8 = vector.load %arg4[%c0_6, %c0_7] : memref<8x128xf32, #tpu.memory_space<vmem>>, vector<8x128xf32>
    %cst_8 = arith.constant dense<0.000000e+00> : vector<8x128xf32>
    %9 = tpu.matmul %8, %7, %cst_8 {dimension_numbers = #tpu.dot_dimension_numbers<[1], [0], [0], [1], [0, 0, 1, 1], [], []>} : vector<8x128xf32>, vector<128x128xf32>, vector<8x128xf32> -> vector<8x128xf32>
    %c0_9 = arith.constant 0 : index
    %c0_10 = arith.constant 0 : index
    %10 = vector.load %arg5[%c0_9, %c0_10] : memref<8x1xf32, #tpu.memory_space<vmem>>, vector<8x1xf32>
    %11 = vector.broadcast %10 : vector<8x1xf32> to vector<8x128xf32>
    %12 = arith.addf %9, %11 : vector<8x128xf32>
    %cst_11 = arith.constant dense<0xFF800000> : vector<128xf32>
    %13 = vector.multi_reduction <maximumf>, %12, %cst_11 [0] : vector<8x128xf32> to vector<128xf32>
    %14 = vector.shape_cast %13 : vector<128xf32> to vector<1x128xf32>
    %15 = vector.broadcast %14 : vector<1x128xf32> to vector<8x128xf32>
    %16 = arith.subf %12, %15 : vector<8x128xf32>
    %17 = math.exp %16 : vector<8x128xf32>
    %cst_12 = arith.constant dense<0.000000e+00> : vector<128xf32>
    %18 = vector.multi_reduction <add>, %17, %cst_12 [0] : vector<8x128xf32> to vector<128xf32>
    %19 = vector.shape_cast %18 : vector<128xf32> to vector<1x128xf32>
    %20 = vector.broadcast %19 : vector<1x128xf32> to vector<8x128xf32>
    %21 = arith.divf %17, %20 : vector<8x128xf32>
    %c0_13 = arith.constant 0 : index
    %c0_14 = arith.constant 0 : index
    %22 = vector.load %arg6[%c0_13, %c0_14] : memref<8x128xf32, #tpu.memory_space<vmem>>, vector<8x128xf32>
    tpu.vector_store %arg6[%c0_13, %c0_14], %21 {strides = array<i32>} : memref<8x128xf32, #tpu.memory_space<vmem>>, vector<8x128xf32>,
    return
  }
  func.func @transform_0(%arg0: i32) -> (i32, i32) {
    %c0_i32 = arith.constant 0 : i32
    %c0_i32_0 = arith.constant 0 : i32
    return %c0_i32, %arg0 : i32, i32
  }
  func.func @transform_1(%arg0: i32) -> (i32, i32) {
    %c0_i32 = arith.constant 0 : i32
    %c0_i32_0 = arith.constant 0 : i32
    %c0_i32_1 = arith.constant 0 : i32
    return %c0_i32, %c0_i32_0 : i32, i32
  }
  func.func @transform_2(%arg0: i32) -> (i32, i32) {
    %c0_i32 = arith.constant 0 : i32
    %c0_i32_0 = arith.constant 0 : i32
    %c0_i32_1 = arith.constant 0 : i32
    return %c0_i32, %c0_i32_0 : i32, i32
  }
  func.func @transform_3(%arg0: i32) -> (i32, i32) {
    %c0_i32 = arith.constant 0 : i32
    %c0_i32_0 = arith.constant 0 : i32
    %c0_i32_1 = arith.constant 0 : i32
    return %c0_i32, %c0_i32_0 : i32, i32
  }
  func.func @transform_4(%arg0: i32) -> (i32, i32) {
    %c0_i32 = arith.constant 0 : i32
    %c0_i32_0 = arith.constant 0 : i32
    %c0_i32_1 = arith.constant 0 : i32
    return %c0_i32, %c0_i32_0 : i32, i32
  }
  func.func @transform_5(%arg0: i32) -> (i32, i32) {
    %c0_i32 = arith.constant 0 : i32
    %c0_i32_0 = arith.constant 0 : i32
    return %c0_i32, %arg0 : i32, i32
  }
}

</mosaic_0001>

<bundles_post_ra>
// kernel: tpu_custom_call.1
= control target key start
LH: loop header
LB: loop body
LE: loop exit
PB: predicated region body
PF: predicated region fallthrough
CT: control target
= control target key end

     0   :  { %vm183_vm0 = vcmask 1043456   ;;  %vm134_vm1 = vcmask 31744   ;;  %v601_v4 = vmov 0   ;;  %s788_s0 = inlined_call_operand.vmem [shape: f32[4,128], index: 0, kind: input, shape index: {}]   ;;  %s789_s1 = inlined_call_operand.vmem [shape: f32[128,4], index: 1, kind: input, shape index: {}]   ;;  %s790_s2 = inlined_call_operand.vmem [shape: f32[128,1], index: 2, kind: input, shape index: {}]   ;;  %s791_s3 = inlined_call_operand.vmem [shape: f32[8,128], index: 3, kind: input, shape index: {}]   ;;  %s792_s4 = inlined_call_operand.vmem [shape: f32[8,1], index: 4, kind: input, shape index: {}]   ;;  %s793_s5 = inlined_call_operand.hbm [shape: f32[8,128], index: 5, kind: output, shape index: {}]  }
   0x1   :  { %v37_v0 = vld [vmem:[%s788_s0] sm:$0xf]  ;;  %v22_v2 = vld [vmem:[%s789_s1 + $0x8] sm:$0xff]  ;;  %v23_v3 = vld [vmem:[%s789_s1 + $0x10] sm:$0xff]  ;;  %573 = vset.pattern.permute.xlu0 %v601_v4  ;;  %574 = vset.pattern.permute.xlu1 %v601_v4 }
   0x2   :  { %v21_v1 = vld [vmem:[%s789_s1] sm:$0xff]  ;;  %508 = vmatprep.subr.msk.mxu0 %vm183_vm0, %v37_v0  ;;  %v24_v5 = vld [vmem:[%s789_s1 + $0x18] sm:$0xff]  ;;  %v51_v8 = vld [vmem:[%s790_s2 + $0x68] sm:$0xff] }
   0x3   :  { %510 = vmatprep.mubr.msk.f32.mxu0 %vm134_vm1, %v21_v1  ;;  %509 = vmatpush3.msk.msra.mxu0 %vm183_vm0, %v37_v0  ;;  %v25_v6 = vld [vmem:[%s789_s1 + $0x20] sm:$0xff]  ;;  %v53_v7 = vld [vmem:[%s790_s2 + $0x78] sm:$0xff]  ;;  %v52_v9 = vld [vmem:[%s790_s2 + $0x70] sm:$0xff] }
   0x4   :  { %511 = vmatmul.mubr.msk.f32.vlgmr.msra.gmra.mxu0 %vm134_vm1, %v22_v2  ;;  %131 = vperm.xlu0 %573, %v53_v7   ;;  %v26_v10 = vld [vmem:[%s789_s1 + $0x28] sm:$0xff]  ;;  %v50_v11 = vld [vmem:[%s790_s2 + $0x60] sm:$0xff]  ;;  %v27_v12 = vld [vmem:[%s789_s1 + $0x30] sm:$0xff] }
   0x5   :  { %513 = vmatprep.mubr.msk.f32.mxu0 %vm134_vm1, %v23_v3  ;;  %121 = vperm.xlu1 %574, %v51_v8   ;;  %v49_v13 = vld [vmem:[%s790_s2 + $0x58] sm:$0xff] }
   0x8   :  { %514 = vmatmul.mubr.msk.f32.gmra.mxu0 %vm134_vm1, %v24_v5  ;;  %126 = vperm.xlu0 %573, %v52_v9  }
   0x9   :  { %516 = vmatprep.mubr.msk.f32.mxu0 %vm134_vm1, %v25_v6  ;;  %116 = vperm.xlu1 %574, %v50_v11  }
   0xc   :  { %517 = vmatmul.mubr.msk.f32.gmra.mxu0 %vm134_vm1, %v26_v10 }
   0xd   :  { %10 = vsyncpa [#allocation3], 0  ;;  %519 = vmatprep.mubr.msk.f32.mxu0 %vm134_vm1, %v27_v12  ;;  %v28_v14 = vld [vmem:[%s789_s1 + $0x38] sm:$0xff]  ;;  %v48_v15 = vld [vmem:[%s790_s2 + $0x50] sm:$0xff]  ;;  %111 = vperm.xlu0 %573, %v49_v13   ;;  %v602_v35 = vmov 0.0   ;;  %vm603_vm2 = vmmov 0  }
   0xe   :  { %v29_v16 = vld [vmem:[%s789_s1 + $0x40] sm:$0xff]  ;;  %106 = vperm.xlu1 %574, %v48_v15   ;;  %v47_v17 = vld [vmem:[%s790_s2 + $0x48] sm:$0xff]  ;;  %v31_v20 = vld [vmem:[%s789_s1 + $0x50] sm:$0xff]  ;;  %534 = vmatprep.subr.mxu1 %v602_v35 }
   0xf   :  { %v30_v18 = vld [vmem:[%s789_s1 + $0x48] sm:$0xff]  ;;  %v46_v19 = vld [vmem:[%s790_s2 + $0x40] sm:$0xff]  ;;  %v45_v21 = vld [vmem:[%s790_s2 + $0x38] sm:$0xff]  ;;  %566 = vmatprep.mubr.msk.f32.mxu1 %vm603_vm2, %v602_v35 }
  0x10   :  { %520 = vmatmul.mubr.msk.f32.gmra.mxu0 %vm134_vm1, %v28_v14  ;;  %v32_v22 = vld [vmem:[%s789_s1 + $0x58] sm:$0xff]  ;;  %v44_v23 = vld [vmem:[%s790_s2 + $0x30] sm:$0xff]  ;;  %v33_v24 = vld [vmem:[%s789_s1 + $0x60] sm:$0xff] }
  0x11   :  { %522 = vmatprep.mubr.msk.f32.mxu0 %vm134_vm1, %v29_v16  ;;  %101 = vperm.xlu0 %573, %v47_v17   ;;  %v43_v25 = vld [vmem:[%s790_s2 + $0x28] sm:$0xff]  ;;  %v42_v27 = vld [vmem:[%s790_s2 + $0x20] sm:$0xff]  ;;  %v35_v28 = vld [vmem:[%s789_s1 + $0x70] sm:$0xff] }
  0x12   :  { %96 = vperm.xlu1 %574, %v46_v19   ;;  %v34_v26 = vld [vmem:[%s789_s1 + $0x68] sm:$0xff]  ;;  %v41_v29 = vld [vmem:[%s790_s2 + $0x18] sm:$0xff]  ;;  %v40_v31 = vld [vmem:[%s790_s2 + $0x10] sm:$0xff] }
  0x13   :  { %v36_v30 = vld [vmem:[%s789_s1 + $0x78] sm:$0xff]  ;;  %v39_v32 = vld [vmem:[%s790_s2 + $0x8] sm:$0xff]  ;;  %v38_v33 = vld [vmem:[%s790_s2] sm:$0xff] }
  0x14   :  { %523 = vmatmul.mubr.msk.f32.gmra.mxu0 %vm134_vm1, %v30_v18  ;;  %v349_v34 = vld [vmem:[%s792_s4] sm:$0xff] }
  0x15   :  { %525 = vmatprep.mubr.msk.f32.mxu0 %vm134_vm1, %v31_v20  ;;  %91 = vperm.xlu0 %573, %v45_v21  }
  0x16   :  { %86 = vperm.xlu1 %574, %v44_v23  }
  0x18   :  { %526 = vmatmul.mubr.msk.f32.gmra.mxu0 %vm134_vm1, %v32_v22 }
  0x19   :  { %528 = vmatprep.mubr.msk.f32.mxu0 %vm134_vm1, %v33_v24  ;;  %81 = vperm.xlu0 %573, %v43_v25  }
  0x1a   :  { %76 = vperm.xlu1 %574, %v42_v27  }
  0x1c   :  { %529 = vmatmul.mubr.msk.f32.gmra.mxu0 %vm134_vm1, %v34_v26 }
  0x1d   :  { %531 = vmatprep.mubr.msk.f32.mxu0 %vm134_vm1, %v35_v28  ;;  %71 = vperm.xlu0 %573, %v41_v29  }
  0x1e   :  { %66 = vperm.xlu1 %574, %v40_v31  }
  0x20   :  { %532 = vmatmul.mubr.msk.f32.gmra.mxu0 %vm134_vm1, %v36_v30 }
  0x21   :  { %61 = vperm.xlu0 %573, %v39_v32  }
  0x22   :  { %56 = vperm.xlu1 %574, %v38_v33  }
  0x25   :  { %352 = vperm.xlu0 %573, %v349_v34  }
  0x7f   :  { %v132_v41 = vpop.permute.xlu0 %131 }
  0x80   :  { %v122_v43 = vpop.permute.xlu1 %121 }
  0x83   :  { %v127_v46 = vpop.permute.xlu0 %126 }
  0x84   :  { %v117_v48 = vpop.permute.xlu1 %116 }
  0x88   :  { %v112_v51 = vpop.permute.xlu0 %111 }
  0x89   :  { %v107_v53 = vpop.permute.xlu1 %106 }
  0x8c   :  { %v102_v56 = vpop.permute.xlu0 %101 }
  0x8d   :  { %v97_v59 = vpop.permute.xlu1 %96 }
  0x90   :  { %v92_v2 = vpop.permute.xlu0 %91 }
  0x91   :  { %v87_v5 = vpop.permute.xlu1 %86 }
  0x94   :  { %v82_v10 = vpop.permute.xlu0 %81 }
  0x95   :  { %v77_v13 = vpop.permute.xlu1 %76 }
  0x98   :  { %v72_v18 = vpop.permute.xlu0 %71 }
  0x99   :  { %v67_v21 = vpop.permute.xlu1 %66 }
  0x9c   :  { %v62_v26 = vpop.permute.xlu0 %61 }
  0x9d   :  { %v57_v29 = vpop.permute.xlu1 %56 }
  0xc4   :  { %v755_v36 = vpop.f32.mrf.mxu0 }
  0xc5   :  { %v259_v30 = vadd.f32 %v755_v36, %v62_v26  ;;  %v348_v36 = vld [vmem:[%s791_s3] sm:$0xff]  ;;  %s604_s3 = smov [#allocation2]  }
  0xc6   :  { %v757_v37 = vpop.f32.mrf.mxu0  ;;  %s449_s7 = sshll.u32 %s604_s3, 4  ;;  %s450_s7 = int_to_ptr.vmem [resolvable:$true] %s449_s7 }
  0xc7   :  { %v254_v32 = vadd.f32 %v757_v37, %v57_v29  ;;  %v333_v34 = vmax.f32 %v259_v30, 0.0  ;;  %s579_s8 = scalar_lea.vmem %s450_s7, 128  ;;  %p584_p1 = scmp.lt.s32.totalorder %s450_s7, %s450_s7 }
  0xc8   :  { %v759_v38 = vpop.f32.mrf.mxu0  ;;  %p580_p0 = scmp.ne.s32.totalorder %s450_s7, %s579_s8  ;;  %p585_p2 = scmp.lt.s32.totalorder %s579_s8, %s579_s8 }
  0xc9   :  { %v269_v24 = vadd.f32 %v759_v38, %v72_v18  ;;  %v332_v38 = vmax.f32 %v254_v32, 0.0 }
  0xca   :  { %v761_v39 = vpop.f32.mrf.mxu0  ;;  %p586_p3 = por %p585_p2, %p584_p1 }
  0xcb   :  { %v264_v27 = vadd.f32 %v761_v39, %v67_v21  ;;  %v335_v31 = vmax.f32 %v269_v24, 0.0  ;;  %v353_v39 = vpop.permute.xlu0 %352 }
  0xcc   :  { %v518_v40 = vpop.f32.mrf.mxu0  ;;  %p587_p4 = pnand %p586_p3, %p580_p0 }
  0xcd   :  { %v279_v19 = vadd.f32 %v518_v40, %v82_v10  ;;  %v334_v33 = vmax.f32 %v264_v27, 0.0 }
  0xce   :  { %v273_v42 = vpop.f32.mrf.mxu0 }
  0xcf   :  { %v274_v22 = vadd.f32 %v273_v42, %v77_v13  ;;  %v337_v25 = vmax.f32 %v279_v19, 0.0 }
  0xd0   :  { %v521_v44 = vpop.f32.mrf.mxu0 }
  0xd1   :  { %v289_v14 = vadd.f32 %v521_v44, %v92_v2  ;;  %v336_v28 = vmax.f32 %v274_v22, 0.0 }
  0xd2   :  { %v283_v45 = vpop.f32.mrf.mxu0 }
  0xd3   :  { %v284_v16 = vadd.f32 %v283_v45, %v87_v5  ;;  %v339_v20 = vmax.f32 %v289_v14, 0.0 }
  0xd4   :  { %v524_v47 = vpop.f32.mrf.mxu0 }
  0xd5   :  { %v299_v8 = vadd.f32 %v524_v47, %v102_v56  ;;  %v338_v23 = vmax.f32 %v284_v16, 0.0 }
  0xd6   :  { %v293_v49 = vpop.f32.mrf.mxu0 }
  0xd7   :  { %v294_v11 = vadd.f32 %v293_v49, %v97_v59  ;;  %v341_v15 = vmax.f32 %v299_v8, 0.0 }
  0xd8   :  { %v527_v50 = vpop.f32.mrf.mxu0 }
  0xd9   :  { %v309_v3 = vadd.f32 %v527_v50, %v112_v51  ;;  %v340_v17 = vmax.f32 %v294_v11, 0.0 }
  0xda   :  { %v303_v52 = vpop.f32.mrf.mxu0 }
  0xdb   :  { %v304_v6 = vadd.f32 %v303_v52, %v107_v53  ;;  %v343_v9 = vmax.f32 %v309_v3, 0.0 }
  0xdc   :  { %v530_v54 = vpop.f32.mrf.mxu0 }
  0xdd   :  { %v319_v61 = vadd.f32 %v530_v54, %v122_v43  ;;  %v342_v12 = vmax.f32 %v304_v6, 0.0 }
  0xde   :  { %v313_v55 = vpop.f32.mrf.mxu0 }
  0xdf   :  { %v314_v0 = vadd.f32 %v313_v55, %v117_v48  ;;  %v345_v4 = vmax.f32 %v319_v61, 0.0 }
  0xe0   :  { %v533_v57 = vpop.f32.mrf.mxu0 }
  0xe1   :  { %v329_v58 = vadd.f32 %v533_v57, %v132_v41  ;;  %v344_v7 = vmax.f32 %v314_v0, 0.0 }
  0xe2   :  { %v323_v60 = vpop.f32.mrf.mxu0 }
  0xe3   :  { %v347_v62 = vmax.f32 %v329_v58, 0.0  ;;  %v324_v63 = vadd.f32 %v323_v60, %v127_v46 }
  0xe5   :  { %v346_v1 = vmax.f32 %v324_v63, 0.0  ;;  %535 = vmatpush3.msra.mxu1 %v347_v62 }
  0xe6   :  { %536 = vmatprep.subr.mxu1 %v602_v35 }
  0xe7   :  { %537 = vmatpush3.msra.mxu1 %v346_v1 }
  0xe8   :  { %538 = vmatprep.subr.mxu1 %v602_v35 }
  0xe9   :  { %539 = vmatpush3.msra.mxu1 %v345_v4 }
  0xea   :  { %540 = vmatprep.subr.mxu1 %v602_v35 }
  0xeb   :  { %541 = vmatpush3.msra.mxu1 %v344_v7 }
  0xec   :  { %542 = vmatprep.subr.mxu1 %v602_v35 }
  0xed   :  { %543 = vmatpush3.msra.mxu1 %v343_v9 }
  0xee   :  { %544 = vmatprep.subr.mxu1 %v602_v35 }
  0xef   :  { %545 = vmatpush3.msra.mxu1 %v342_v12 }
  0xf0   :  { %546 = vmatprep.subr.mxu1 %v602_v35 }
  0xf1   :  { %547 = vmatpush3.msra.mxu1 %v341_v15 }
  0xf2   :  { %548 = vmatprep.subr.mxu1 %v602_v35 }
  0xf3   :  { %549 = vmatpush3.msra.mxu1 %v340_v17 }
  0xf4   :  { %550 = vmatprep.subr.mxu1 %v602_v35 }
  0xf5   :  { %551 = vmatpush3.msra.mxu1 %v339_v20 }
  0xf6   :  { %552 = vmatprep.subr.mxu1 %v602_v35 }
  0xf7   :  { %553 = vmatpush3.msra.mxu1 %v338_v23 }
  0xf8   :  { %554 = vmatprep.subr.mxu1 %v602_v35 }
  0xf9   :  { %555 = vmatpush3.msra.mxu1 %v337_v25 }
  0xfa   :  { %556 = vmatprep.subr.mxu1 %v602_v35 }
  0xfb   :  { %557 = vmatpush3.msra.mxu1 %v336_v28 }
  0xfc   :  { %558 = vmatprep.subr.mxu1 %v602_v35 }
  0xfd   :  { %559 = vmatpush3.msra.mxu1 %v335_v31 }
  0xfe   :  { %560 = vmatprep.subr.mxu1 %v602_v35 }
  0xff   :  { %561 = vmatpush3.msra.mxu1 %v334_v33 }
 0x100   :  { %562 = vmatprep.subr.mxu1 %v602_v35 }
 0x101   :  { %563 = vmatpush3.msra.mxu1 %v333_v34 }
 0x102   :  { %564 = vmatprep.subr.mxu1 %v602_v35 }
 0x103   :  { %565 = vmatpush3.msra.mxu1 %v332_v38 }
 0x104   :  { %567 = vmatmul.mubr.f32.vlgmr.msra.gmra.mxu1 %v348_v36 }
 0x1c4   :  { %v421_v37 = vpop.f32.mrf.mxu1 }
 0x1c5   :  { %v422_v40 = vadd.f32 %v421_v37, %v353_v39 }
 0x1c6   :  { %v568_v41 = vpop.f32.mrf.mxu1 }
 0x1c7   :  { %v425_v42 = vrot.slane %v422_v40, 4 }
 0x1c9   :  { %v426_v43 = vmax.f32 %v422_v40, %v425_v42 }
 0x1cb   :  { %v427_v44 = vrot.slane %v426_v43, 2 }
 0x1cd   :  { %v428_v45 = vmax.f32 %v426_v43, %v427_v44 }
 0x1cf   :  { %v429_v46 = vrot.slane %v428_v45, 1 }
 0x1d1   :  { %v430_v47 = vmax.f32 %v428_v45, %v429_v46 }
 0x1d3   :  { %v431_v48 = vsub.f32 %v422_v40, %v430_v47 }
 0x1d5   :  { %v432_v49 = vmul.f32 1.442695, %v431_v48 }
 0x1d7   :  { %575 = vpow2.f32 %v432_v49 }
 0x1e4   :  { %v576_v50 = vpop.eup %575 }
 0x1e5   :  { %v434_v51 = vrot.slane %v576_v50, 4 }
 0x1e7   :  { %v435_v52 = vadd.f32 %v576_v50, %v434_v51 }
 0x1e9   :  { %v436_v53 = vrot.slane %v435_v52, 2 }
 0x1eb   :  { %v437_v35 = vadd.f32 %v436_v53, %v435_v52 }
 0x1ed   :  { %v438_v54 = vrot.slane %v437_v35, 1 }
 0x1ef   :  { %v439_v55 = vadd.f32 %v438_v54, %v437_v35 }
 0x1f1   :  { %577 = vrcp.f32 %v439_v55 }
 0x1fe   :  { %v578_v56 = vpop.eup %577 }
 0x1ff   :  { %v441_v57 = vmul.f32 %v578_v56, %v576_v50 }
 0x201   :  { %442 = vst [vmem:[#allocation2] sm:$0xff] %v441_v57 }
 0x202   :  { %590 = shalt.err (!%p587_p4)
}
 0x203   :  { %452 = dma.vmem_to_hbm [thread:$0]  %s450_s7, 128, %s793_s5, [#allocation3]  }
 0x204   :  { %599 = dma.done.wait [#allocation3], 128  }
 0x205   :  { %600 = vsyncadd [#allocation3], 4294967168 }
 0x206   :  { %456 = vsyncpa [#allocation3], 1 }

</bundles_post_ra>
